<compile_context>
chip_gen: v7x
topology: tpu7x:2x2x1
jax: 0.10.0
libtpu: 0.0.40
codegen_flags: <defaults>
</compile_context>

<pallas_src>
import math
import jax
import jax.numpy as jnp
from jax.experimental import pallas as pl
from jax.experimental.pallas import tpu as pltpu


# ---------------------------------------------------------------------------
# Phase 1: sequential LSTM recurrence (embedding lookup done in the wrapper).
# ---------------------------------------------------------------------------
def _lstm_recurrence_kernel(x_ref, h0_ref, c0_ref, wg_ref, b_ref,
                            hseq_ref, h_out_ref, c_out_ref,
                            h_scr, c_scr):
    t = pl.program_id(0)

    # Load the initial recurrent state once.
    @pl.when(t == 0)
    def _():
        h_scr[...] = h0_ref[...]
        c_scr[...] = c0_ref[...]

    H = h_scr.shape[-1]
    # dropout (eval) = identity; then F.relu on the embedded input
    x = jnp.maximum(x_ref[0].astype(jnp.float32), 0.0)                 # (B, H)
    # fused gate GEMM: [x, h] @ [W_ih^T ; W_hh^T] -> (B, 4H)
    xh = jnp.concatenate([x, h_scr[...]], axis=-1).astype(jnp.bfloat16)
    gates = (jnp.dot(xh, wg_ref[...], preferred_element_type=jnp.float32)
             + b_ref[...])
    i_g = jax.nn.sigmoid(gates[:, 0 * H:1 * H])
    f_g = jax.nn.sigmoid(gates[:, 1 * H:2 * H])
    g_g = jnp.tanh(gates[:, 2 * H:3 * H])
    o_g = jax.nn.sigmoid(gates[:, 3 * H:4 * H])
    c_new = f_g * c_scr[...] + i_g * g_g
    h_new = o_g * jnp.tanh(c_new)
    h_scr[...] = h_new
    c_scr[...] = c_new

    # Per-step hidden state for the batched projection phase (bf16, cast once).
    hseq_ref[0] = h_new.astype(jnp.bfloat16)

    # Final state written only once, at the last timestep.
    @pl.when(t == pl.num_programs(0) - 1)
    def _():
        h_out_ref[...] = h_new
        c_out_ref[...] = c_new


# ---------------------------------------------------------------------------
# Phase 2: batched output projection  logits = h_seq @ W_out^T + b_out.
# ---------------------------------------------------------------------------
def _projection_kernel(h_ref, wout_ref, bout_ref, logits_ref):
    logits_ref[...] = (jnp.dot(h_ref[...], wout_ref[...],
                               preferred_element_type=jnp.float32)
                       + bout_ref[...])


def _pick_tile(n, max_tile, mult):
    """Largest divisor of n that is a multiple of `mult` and <= max_tile (else n)."""
    if n <= max_tile:
        return n
    t = max_tile - (max_tile % mult)
    while t >= mult:
        if n % t == 0:
            return t
        t -= mult
    return n


def _vmem_limit(nbytes):
    """Generation-aware scoped-VMEM limit: real footprint + headroom, clamped."""
    return int(min(128 * 1024 * 1024, max(32 * 1024 * 1024, 1.3 * nbytes)))


def decoder_lstm_decode(tokens_seq, hidden, cell, params, *, tile_o=1024, tile_r=512):
    """Run T decode steps (teacher-forced tokens known up-front).

    tokens_seq: int32 (T, B); hidden, cell: f32 (1, B, H)
    returns logits_seq (T, B, O) f32, (hidden (1,B,H), cell (1,B,H)) after last step.
    """
    emb = params["embedding"]          # (O, H)   bf16
    wg = params["w_gates"]             # (2H, 4H) bf16  == [W_ih^T ; W_hh^T]
    b = params["b"]                    # (1, 4H)  f32   == b_ih + b_hh
    wout = params["wout_t"]            # (H, O)   bf16  == out.weight.T
    bout = params["bout"]              # (1, O)   f32

    T, B = tokens_seq.shape
    H = hidden.shape[-1]
    O = emb.shape[0]
    assert B % 8 == 0, "batch must be a multiple of 8 (sublane alignment)"
    assert H % 128 == 0 and O % 128 == 0, "hidden/vocab must be multiples of 128"

    # TODO(synk): fuse the embedding gather into phase 1 (PrefetchScalarGridSpec with
    # num_scalar_prefetch=1, emb kept in HBM via memory_space=pl.ANY, B row DMAs issued
    # one timestep ahead) to drop this separate XLA gather kernel.
    x_seq = emb[tokens_seq]            # (T, B, H) bf16
    h0, c0 = hidden[0], cell[0]        # (B, H) f32

    # ---------------- Phase 1: recurrence (gate weights VMEM-resident) ----------------
    p1_bytes = (2 * (B * H * 2                     # x block (bf16), double-buffered
                     + 2 * B * H * 4               # h0, c0
                     + (2 * H) * (4 * H) * 2       # fused gate weights (bf16)
                     + 4 * H * 4                   # bias
                     + B * H * 2                   # h_seq out block (bf16)
                     + 2 * B * H * 4)              # hT, cT outputs
                + 2 * B * H * 4)                   # scratch carries
    h_seq, h_new, c_new = pl.pallas_call(
        _lstm_recurrence_kernel,
        grid_spec=pltpu.PrefetchScalarGridSpec(
            num_scalar_prefetch=0,
            grid=(T,),
            in_specs=[
                pl.BlockSpec((1, B, H), lambda t: (t, 0, 0)),      # x at step t (streamed)
                pl.BlockSpec((B, H), lambda t: (0, 0)),            # h0 (resident)
                pl.BlockSpec((B, H), lambda t: (0, 0)),            # c0 (resident)
                pl.BlockSpec((2 * H, 4 * H), lambda t: (0, 0)),    # fused gate weights (resident)
                pl.BlockSpec((1, 4 * H), lambda t: (0, 0)),        # combined bias (resident)
            ],
            out_specs=[
                pl.BlockSpec((1, B, H), lambda t: (t, 0, 0)),      # h_seq (bf16, per step)
                pl.BlockSpec((B, H), lambda t: (0, 0)),            # final hidden
                pl.BlockSpec((B, H), lambda t: (0, 0)),            # final cell
            ],
            scratch_shapes=[
                pltpu.VMEM((B, H), jnp.float32),                   # h carry
                pltpu.VMEM((B, H), jnp.float32),                   # c carry
            ],
        ),
        out_shape=[
            jax.ShapeDtypeStruct((T, B, H), jnp.bfloat16),
            jax.ShapeDtypeStruct((B, H), jnp.float32),
            jax.ShapeDtypeStruct((B, H), jnp.float32),
        ],
        compiler_params=pltpu.CompilerParams(
            dimension_semantics=("arbitrary",),
            vmem_limit_bytes=_vmem_limit(p1_bytes),
        ),
    )(x_seq, h0, c0, wg, b)

    # -------- Phase 2: batched projection (W_out streamed exactly once per call) --------
    TB = T * B
    t_o = _pick_tile(O, max(tile_o, 128), 128)     # lane-dense vocab tile
    t_r = _pick_tile(TB, max(tile_r, 8), 8)        # row tile over T*B
    n_o, n_r = O // t_o, TB // t_r

    h_flat = h_seq.reshape(TB, H)                  # contiguous, free reshape
    p2_bytes = 2 * (t_r * H * 2 + H * t_o * 2 + t_o * 4 + t_r * t_o * 4)
    logits_flat = pl.pallas_call(
        _projection_kernel,
        grid_spec=pltpu.PrefetchScalarGridSpec(
            num_scalar_prefetch=0,
            # Vocab tile OUTER / rows inner: each W_out tile's block index is constant
            # across the inner row axis, so W_out is DMA'd from HBM exactly once.
            grid=(n_o, n_r),
            in_specs=[
                pl.BlockSpec((t_r, H), lambda j, r: (r, 0)),       # h rows (bf16, small)
                pl.BlockSpec((H, t_o), lambda j, r: (0, j)),       # W_out tile (streamed once)
                pl.BlockSpec((1, t_o), lambda j, r: (0, j)),       # b_out tile
            ],
            out_specs=pl.BlockSpec((t_r, t_o), lambda j, r: (r, j)),
        ),
        out_shape=jax.ShapeDtypeStruct((TB, O), jnp.float32),
        compiler_params=pltpu.CompilerParams(
            # both axes independent -> v7x megacore shards them; no-op on v5e/v6e
            dimension_semantics=("parallel", "parallel"),
            vmem_limit_bytes=_vmem_limit(p2_bytes),
        ),
    )(h_flat, wout, bout)

    logits_seq = logits_flat.reshape(T, B, O)
    return logits_seq, (h_new[None, :, :], c_new[None, :, :])


def decoder_lstm_forward(tokens, hidden, cell, params, *, tile_o=1024):
    """Mirrors DecoderLSTM.forward (single decode step).

    tokens: int32 (B,), hidden/cell: f32 (1, B, H)
    returns (logits (B, O), (hidden (1,B,H), cell (1,B,H)))
    """
    logits_seq, (h, c) = decoder_lstm_decode(tokens[None, :], hidden, cell, params,
                                             tile_o=tile_o)
    return logits_seq[0], (h, c)


def init_params(key, hidden_size, output_size):
    """Deterministic init mirroring DecoderLSTM.__init__ shapes (weights stored bf16)."""
    H, O = hidden_size, output_size
    k = 1.0 / math.sqrt(H)
    keys = jax.random.split(key, 7)
    emb = jax.random.normal(keys[0], (O, H), jnp.float32)
    w_ih = jax.random.uniform(keys[1], (4 * H, H), jnp.float32, -k, k)
    w_hh = jax.random.uniform(keys[2], (4 * H, H), jnp.float32, -k, k)
    b_ih = jax.random.uniform(keys[3], (4 * H,), jnp.float32, -k, k)
    b_hh = jax.random.uniform(keys[4], (4 * H,), jnp.float32, -k, k)
    w_out = jax.random.uniform(keys[5], (O, H), jnp.float32, -k, k)
    b_out = jax.random.uniform(keys[6], (O,), jnp.float32, -k, k)
    w_gates = jnp.concatenate([w_ih.T, w_hh.T], axis=0)       # (2H, 4H)
    return {
        "embedding": emb.astype(jnp.bfloat16),                # (O, H)
        "w_gates": w_gates.astype(jnp.bfloat16),              # (2H, 4H)
        "b": (b_ih + b_hh)[None, :].astype(jnp.float32),      # (1, 4H)
        "wout_t": w_out.T.astype(jnp.bfloat16),               # (H, O)
        "bout": b_out[None, :].astype(jnp.float32),           # (1, O)
    }


def reference_decode(tokens_seq, hidden, cell, params):
    """Pure-JAX reference of the same T-step forward pass (same bf16 weights / f32 accum)."""
    h, c = hidden[0], cell[0]
    H = h.shape[-1]
    logits_list = []
    for t in range(tokens_seq.shape[0]):
        x = jnp.maximum(params["embedding"][tokens_seq[t]].astype(jnp.float32), 0.0)
        xh = jnp.concatenate([x, h], axis=-1).astype(jnp.bfloat16)
        gates = (jnp.dot(xh, params["w_gates"], preferred_element_type=jnp.float32)
                 + params["b"])
        i = jax.nn.sigmoid(gates[:, 0 * H:1 * H])
        f = jax.nn.sigmoid(gates[:, 1 * H:2 * H])
        g = jnp.tanh(gates[:, 2 * H:3 * H])
        o = jax.nn.sigmoid(gates[:, 3 * H:4 * H])
        c = f * c + i * g
        h = o * jnp.tanh(c)
        logits = (jnp.dot(h.astype(jnp.bfloat16), params["wout_t"],
                          preferred_element_type=jnp.float32)
                  + params["bout"])
        logits_list.append(logits)
    return jnp.stack(logits_list), (h[None], c[None])


if __name__ == "__main__":
    # Lane/sublane aligned small shapes: batch=8, hidden=128, vocab=256, 3 decode steps.
    B, H, O, T = 8, 128, 256, 3
    TILE_O = 128                       # small tile so the test exercises W_out streaming (2 tiles)

    key = jax.random.PRNGKey(0)
    k_param, k_tok, k_h, k_c = jax.random.split(key, 4)

    params = init_params(k_param, H, O)
    tokens_seq = jax.random.randint(k_tok, (T, B), 0, O, dtype=jnp.int32)
    hidden = jax.random.normal(k_h, (1, B, H), jnp.float32)
    cell = jax.random.normal(k_c, (1, B, H), jnp.float32)

    # --- single-step forward (module semantics) ---
    logits, (h1, c1) = decoder_lstm_forward(tokens_seq[0], hidden, cell, params, tile_o=TILE_O)
    jax.block_until_ready((logits, h1, c1))
    ref_l1, (ref_h1, ref_c1) = reference_decode(tokens_seq[:1], hidden, cell, params)
    assert jnp.allclose(logits, ref_l1[0], atol=2e-2, rtol=2e-2), "logits mismatch (step)"
    assert jnp.allclose(h1, ref_h1, atol=2e-2, rtol=2e-2), "hidden mismatch (step)"
    assert jnp.allclose(c1, ref_c1, atol=2e-2, rtol=2e-2), "cell mismatch (step)"

    # --- multi-step decode (W_out streamed once; projection batched over T*B rows) ---
    logits_seq, (hT, cT) = decoder_lstm_decode(tokens_seq, hidden, cell, params, tile_o=TILE_O)
    jax.block_until_ready((logits_seq, hT, cT))
    ref_seq, (ref_hT, ref_cT) = reference_decode(tokens_seq, hidden, cell, params)
    assert jnp.allclose(logits_seq, ref_seq, atol=2e-2, rtol=2e-2), "logits mismatch (seq)"
    assert jnp.allclose(hT, ref_hT, atol=2e-2, rtol=2e-2), "hidden mismatch (seq)"
    assert jnp.allclose(cT, ref_cT, atol=2e-2, rtol=2e-2), "cell mismatch (seq)"

    print("KERNEL_OK")
</pallas_src>

<mosaic_0001>
module attributes {stable_mosaic.version = 11 : i64} {
  func.func @_lstm_recurrence_kernel(%arg0: i32, %arg1: memref<1x8x128xbf16, #tpu.memory_space<vmem>>, %arg2: memref<8x128xf32, #tpu.memory_space<vmem>>, %arg3: memref<8x128xf32, #tpu.memory_space<vmem>>, %arg4: memref<256x512xbf16, #tpu.memory_space<vmem>>, %arg5: memref<1x512xf32, #tpu.memory_space<vmem>>, %arg6: memref<1x8x128xbf16, #tpu.memory_space<vmem>>, %arg7: memref<8x128xf32, #tpu.memory_space<vmem>>, %arg8: memref<8x128xf32, #tpu.memory_space<vmem>>, %arg9: memref<8x128xf32, #tpu.memory_space<vmem>>, %arg10: memref<8x128xf32, #tpu.memory_space<vmem>>) attributes {dimension_semantics = [#tpu.dimension_semantics<arbitrary>], iteration_bounds = array<i64: 1>, scalar_prefetch = 0 : i64, scratch_operands = 2 : i64, tpu.core_type = #tpu.core_type<tc>, window_params = [{transform_indices = @transform_0, window_bounds = array<i64: 1, 8, 128>}, {pipeline_mode = #tpu.pipeline_mode<synchronous>, transform_indices = @transform_1, window_bounds = array<i64: 8, 128>}, {pipeline_mode = #tpu.pipeline_mode<synchronous>, transform_indices = @transform_2, window_bounds = array<i64: 8, 128>}, {pipeline_mode = #tpu.pipeline_mode<synchronous>, transform_indices = @transform_3, window_bounds = array<i64: 256, 512>}, {pipeline_mode = #tpu.pipeline_mode<synchronous>, transform_indices = @transform_4, window_bounds = array<i64: 1, 512>}, {transform_indices = @transform_5, window_bounds = array<i64: 1, 8, 128>}, {pipeline_mode = #tpu.pipeline_mode<synchronous>, transform_indices = @transform_6, window_bounds = array<i64: 8, 128>}, {pipeline_mode = #tpu.pipeline_mode<synchronous>, transform_indices = @transform_7, window_bounds = array<i64: 8, 128>}]} {
    %c0_i32 = arith.constant 0 : i32
    %0 = arith.cmpi eq, %arg0, %c0_i32 : i32
    %1 = arith.extui %0 : i1 to i32
    %c0_i32_0 = arith.constant 0 : i32
    %2 = arith.cmpi ne, %1, %c0_i32_0 : i32
    scf.if %2 {
      %c0_24 = arith.constant 0 : index
      %c0_25 = arith.constant 0 : index
      %51 = vector.load %arg2[%c0_24, %c0_25] : memref<8x128xf32, #tpu.memory_space<vmem>>, vector<8x128xf32>
      %c0_26 = arith.constant 0 : index
      %c0_27 = arith.constant 0 : index
      %52 = vector.load %arg9[%c0_26, %c0_27] : memref<8x128xf32, #tpu.memory_space<vmem>>, vector<8x128xf32>
      tpu.vector_store %arg9[%c0_26, %c0_27], %51 {strides = array<i32>} : memref<8x128xf32, #tpu.memory_space<vmem>>, vector<8x128xf32>,
      %c0_28 = arith.constant 0 : index
      %c0_29 = arith.constant 0 : index
      %53 = vector.load %arg3[%c0_28, %c0_29] : memref<8x128xf32, #tpu.memory_space<vmem>>, vector<8x128xf32>
      %c0_30 = arith.constant 0 : index
      %c0_31 = arith.constant 0 : index
      %54 = vector.load %arg10[%c0_30, %c0_31] : memref<8x128xf32, #tpu.memory_space<vmem>>, vector<8x128xf32>
      tpu.vector_store %arg10[%c0_30, %c0_31], %53 {strides = array<i32>} : memref<8x128xf32, #tpu.memory_space<vmem>>, vector<8x128xf32>,
    } else {
    }
    %c0 = arith.constant 0 : index
    %c0_1 = arith.constant 0 : index
    %c0_2 = arith.constant 0 : index
    %3 = vector.load %arg1[%c0, %c0_1, %c0_2] : memref<1x8x128xbf16, #tpu.memory_space<vmem>>, vector<1x8x128xbf16>
    %4 = vector.shape_cast %3 : vector<1x8x128xbf16> to vector<8x128xbf16>
    %5 = arith.extf %4 : vector<8x128xbf16> to vector<8x128xf32>
    %cst = arith.constant 0.000000e+00 : f32
    %6 = vector.broadcast %cst : f32 to vector<8x128xf32>
    %7 = arith.maximumf %5, %6 : vector<8x128xf32>
    %c0_3 = arith.constant 0 : index
    %c0_4 = arith.constant 0 : index
    %8 = vector.load %arg9[%c0_3, %c0_4] : memref<8x128xf32, #tpu.memory_space<vmem>>, vector<8x128xf32>
    %9 = tpu.concatenate %7, %8 in 1 : vector<8x128xf32>, vector<8x128xf32> -> vector<8x256xf32>
    %10 = arith.truncf %9 : vector<8x256xf32> to vector<8x256xbf16>
    %c0_5 = arith.constant 0 : index
    %c0_6 = arith.constant 0 : index
    %11 = vector.load %arg4[%c0_5, %c0_6] : memref<256x512xbf16, #tpu.memory_space<vmem>>, vector<256x512xbf16>
    %cst_7 = arith.constant dense<0.000000e+00> : vector<8x512xf32>
    %12 = tpu.matmul %10, %11, %cst_7 {dimension_numbers = #tpu.dot_dimension_numbers<[1], [0], [0], [1], [0, 0, 1, 1], [], []>} : vector<8x256xbf16>, vector<256x512xbf16>, vector<8x512xf32> -> vector<8x512xf32>
    %c0_8 = arith.constant 0 : index
    %c0_9 = arith.constant 0 : index
    %13 = vector.load %arg5[%c0_8, %c0_9] : memref<1x512xf32, #tpu.memory_space<vmem>>, vector<1x512xf32>
    %14 = vector.broadcast %13 : vector<1x512xf32> to vector<8x512xf32>
    %15 = arith.addf %12, %14 : vector<8x512xf32>
    %16 = vector.extract_strided_slice %15 {offsets = [0, 0], sizes = [8, 128], strides = [1, 1]} : vector<8x512xf32> to vector<8x128xf32>
    %17 = arith.negf %16 : vector<8x128xf32>
    %18 = math.exp %17 : vector<8x128xf32>
    %cst_10 = arith.constant 1.000000e+00 : f32
    %19 = vector.broadcast %cst_10 : f32 to vector<8x128xf32>
    %20 = arith.addf %19, %18 : vector<8x128xf32>
    %21 = arith.divf %19, %20 : vector<8x128xf32>
    %22 = vector.extract_strided_slice %15 {offsets = [0, 128], sizes = [8, 128], strides = [1, 1]} : vector<8x512xf32> to vector<8x128xf32>
    %23 = arith.negf %22 : vector<8x128xf32>
    %24 = math.exp %23 : vector<8x128xf32>
    %cst_11 = arith.constant 1.000000e+00 : f32
    %25 = vector.broadcast %cst_11 : f32 to vector<8x128xf32>
    %26 = arith.addf %25, %24 : vector<8x128xf32>
    %27 = arith.divf %25, %26 : vector<8x128xf32>
    %28 = vector.extract_strided_slice %15 {offsets = [0, 256], sizes = [8, 128], strides = [1, 1]} : vector<8x512xf32> to vector<8x128xf32>
    %29 = math.tanh %28 : vector<8x128xf32>
    %30 = vector.extract_strided_slice %15 {offsets = [0, 384], sizes = [8, 128], strides = [1, 1]} : vector<8x512xf32> to vector<8x128xf32>
    %31 = arith.negf %30 : vector<8x128xf32>
    %32 = math.exp %31 : vector<8x128xf32>
    %cst_12 = arith.constant 1.000000e+00 : f32
    %33 = vector.broadcast %cst_12 : f32 to vector<8x128xf32>
    %34 = arith.addf %33, %32 : vector<8x128xf32>
    %35 = arith.divf %33, %34 : vector<8x128xf32>
    %c0_13 = arith.constant 0 : index
    %c0_14 = arith.constant 0 : index
    %36 = vector.load %arg10[%c0_13, %c0_14] : memref<8x128xf32, #tpu.memory_space<vmem>>, vector<8x128xf32>
    %37 = arith.mulf %27, %36 : vector<8x128xf32>
    %38 = arith.mulf %21, %29 : vector<8x128xf32>
    %39 = arith.addf %37, %38 : vector<8x128xf32>
    %40 = math.tanh %39 : vector<8x128xf32>
    %41 = arith.mulf %35, %40 : vector<8x128xf32>
    %c0_15 = arith.constant 0 : index
    %c0_16 = arith.constant 0 : index
    %42 = vector.load %arg9[%c0_15, %c0_16] : memref<8x128xf32, #tpu.memory_space<vmem>>, vector<8x128xf32>
    tpu.vector_store %arg9[%c0_15, %c0_16], %41 {strides = array<i32>} : memref<8x128xf32, #tpu.memory_space<vmem>>, vector<8x128xf32>,
    %c0_17 = arith.constant 0 : index
    %c0_18 = arith.constant 0 : index
    %43 = vector.load %arg10[%c0_17, %c0_18] : memref<8x128xf32, #tpu.memory_space<vmem>>, vector<8x128xf32>
    tpu.vector_store %arg10[%c0_17, %c0_18], %39 {strides = array<i32>} : memref<8x128xf32, #tpu.memory_space<vmem>>, vector<8x128xf32>,
    %44 = arith.truncf %41 : vector<8x128xf32> to vector<8x128xbf16>
    %c0_19 = arith.constant 0 : index
    %c0_20 = arith.constant 0 : index
    %c0_21 = arith.constant 0 : index
    %45 = vector.load %arg6[%c0_19, %c0_20, %c0_21] : memref<1x8x128xbf16, #tpu.memory_space<vmem>>, vector<1x8x128xbf16>
    %46 = vector.shape_cast %45 : vector<1x8x128xbf16> to vector<8x128xbf16>
    %47 = vector.shape_cast %44 : vector<8x128xbf16> to vector<1x8x128xbf16>
    tpu.vector_store %arg6[%c0_19, %c0_20, %c0_21], %47 {strides = array<i32>} : memref<1x8x128xbf16, #tpu.memory_space<vmem>>, vector<1x8x128xbf16>,
    %c0_i32_22 = arith.constant 0 : i32
    %48 = arith.cmpi eq, %arg0, %c0_i32_22 : i32
    %49 = arith.extui %48 : i1 to i32
    %c0_i32_23 = arith.constant 0 : i32
    %50 = arith.cmpi ne, %49, %c0_i32_23 : i32
    scf.if %50 {
      %c0_24 = arith.constant 0 : index
      %c0_25 = arith.constant 0 : index
      %51 = vector.load %arg7[%c0_24, %c0_25] : memref<8x128xf32, #tpu.memory_space<vmem>>, vector<8x128xf32>
      tpu.vector_store %arg7[%c0_24, %c0_25], %41 {strides = array<i32>} : memref<8x128xf32, #tpu.memory_space<vmem>>, vector<8x128xf32>,
      %c0_26 = arith.constant 0 : index
      %c0_27 = arith.constant 0 : index
      %52 = vector.load %arg8[%c0_26, %c0_27] : memref<8x128xf32, #tpu.memory_space<vmem>>, vector<8x128xf32>
      tpu.vector_store %arg8[%c0_26, %c0_27], %39 {strides = array<i32>} : memref<8x128xf32, #tpu.memory_space<vmem>>, vector<8x128xf32>,
    } else {
    }
    return
  }
  func.func @transform_0(%arg0: i32) -> (i32, i32, i32) {
    %c0_i32 = arith.constant 0 : i32
    %c0_i32_0 = arith.constant 0 : i32
    %c0_i32_1 = arith.constant 0 : i32
    return %arg0, %c0_i32, %c0_i32_0 : i32, i32, i32
  }
  func.func @transform_1(%arg0: i32) -> (i32, i32) {
    %c0_i32 = arith.constant 0 : i32
    %c0_i32_0 = arith.constant 0 : i32
    %c0_i32_1 = arith.constant 0 : i32
    return %c0_i32, %c0_i32_0 : i32, i32
  }
  func.func @transform_2(%arg0: i32) -> (i32, i32) {
    %c0_i32 = arith.constant 0 : i32
    %c0_i32_0 = arith.constant 0 : i32
    %c0_i32_1 = arith.constant 0 : i32
    return %c0_i32, %c0_i32_0 : i32, i32
  }
  func.func @transform_3(%arg0: i32) -> (i32, i32) {
    %c0_i32 = arith.constant 0 : i32
    %c0_i32_0 = arith.constant 0 : i32
    %c0_i32_1 = arith.constant 0 : i32
    return %c0_i32, %c0_i32_0 : i32, i32
  }
  func.func @transform_4(%arg0: i32) -> (i32, i32) {
    %c0_i32 = arith.constant 0 : i32
    %c0_i32_0 = arith.constant 0 : i32
    %c0_i32_1 = arith.constant 0 : i32
    return %c0_i32, %c0_i32_0 : i32, i32
  }
  func.func @transform_5(%arg0: i32) -> (i32, i32, i32) {
    %c0_i32 = arith.constant 0 : i32
    %c0_i32_0 = arith.constant 0 : i32
    %c0_i32_1 = arith.constant 0 : i32
    return %arg0, %c0_i32, %c0_i32_0 : i32, i32, i32
  }
  func.func @transform_6(%arg0: i32) -> (i32, i32) {
    %c0_i32 = arith.constant 0 : i32
    %c0_i32_0 = arith.constant 0 : i32
    %c0_i32_1 = arith.constant 0 : i32
    return %c0_i32, %c0_i32_0 : i32, i32
  }
  func.func @transform_7(%arg0: i32) -> (i32, i32) {
    %c0_i32 = arith.constant 0 : i32
    %c0_i32_0 = arith.constant 0 : i32
    %c0_i32_1 = arith.constant 0 : i32
    return %c0_i32, %c0_i32_0 : i32, i32
  }
}

</mosaic_0001>

<bundles_post_ra>
// kernel: tpu_custom_call.1
= control target key start
LH: loop header
LB: loop body
LE: loop exit
PB: predicated region body
PF: predicated region fallthrough
CT: control target
= control target key end

     0   :  { %13 = vsyncpa [#allocation5], 0  ;;  %s1163_s0 = inlined_call_operand.hbm [shape: bf16[1,8,128], index: 0, kind: input, shape index: {}]   ;;  %s1164_s1 = inlined_call_operand.hbm [shape: f32[8,128], index: 1, kind: input, shape index: {}]   ;;  %s1165_s2 = inlined_call_operand.hbm [shape: f32[8,128], index: 2, kind: input, shape index: {}]   ;;  %s1166_s3 = inlined_call_operand.hbm [shape: bf16[256,512], index: 3, kind: input, shape index: {}]   ;;  %s1167_s4 = inlined_call_operand.vmem [shape: f32[1,512], index: 4, kind: input, shape index: {}]   ;;  %s1168_s5 = inlined_call_operand.hbm [shape: bf16[1,8,128], index: 5, kind: output, shape index: {0}]   ;;  %s1169_s6 = inlined_call_operand.hbm [shape: f32[8,128], index: 6, kind: output, shape index: {1}]   ;;  %s1170_s7 = inlined_call_operand.hbm [shape: f32[8,128], index: 7, kind: output, shape index: {2}]  }
   0x1   :  { %14 = vsyncpa [#allocation8], 0 }
   0x2   :  { %15 = vsyncpa [#allocation11], 0 }
   0x3   :  { %16 = vsyncpa [#allocation6], 0 }
   0x4   :  { %17 = vsyncpa [#allocation14], 0  ;;  %s1006_s24 = smov [#allocation7]   ;;  %s1007_s26 = smov [#allocation4]  }
   0x5   :  { %s34_s25 = sshll.u32 %s1006_s24, 4  ;;  %s24_s27 = sshll.u32 %s1007_s26, 4  ;;  %s35_s25 = int_to_ptr.vmem [resolvable:$true] %s34_s25  ;;  %s25_s27 = int_to_ptr.vmem [resolvable:$true] %s24_s27 }
   0x6   :  { %s842_s30 = scalar_lea.hbm %s1164_s1, 128 }
   0x7   :  { %p843_p0 = scmp.ne.s32.totalorder %s1164_s1, %s842_s30  ;;  %p846_p1 = scmp.lt.u32.totalorder %s842_s30, %s1164_s1 }
   0x9   :  { %p848_p2 = pnand %p846_p1, %p843_p0 }
   0xb   :  { %851 = shalt.err (!%p848_p2)
}
   0xc   :  { %s852_s12 = scalar_lea.vmem %s35_s25, 128  ;;  %p857_p4 = scmp.lt.s32.totalorder %s35_s25, %s35_s25 }
   0xd   :  { %p853_p3 = scmp.ne.s32.totalorder %s35_s25, %s852_s12  ;;  %p858_p5 = scmp.lt.s32.totalorder %s852_s12, %s852_s12 }
   0xf   :  { %p859_p6 = por %p858_p5, %p857_p4 }
  0x11   :  { %p860_p7 = pnand %p859_p6, %p853_p3 }
  0x13   :  { %863 = shalt.err (!%p860_p7)
}
  0x14   :  { %37 = dma.hbm_to_vmem [thread:$0]  %s1164_s1, 128, %s35_s25, [#allocation8]  }
  0x15   :  { %s864_s17 = scalar_lea.hbm %s1163_s0, 64 }
  0x16   :  { %p865_p8 = scmp.ne.s32.totalorder %s1163_s0, %s864_s17  ;;  %p868_p9 = scmp.lt.u32.totalorder %s864_s17, %s1163_s0 }
  0x18   :  { %p870_p10 = pnand %p868_p9, %p865_p8 }
  0x1a   :  { %873 = shalt.err (!%p870_p10)
}
  0x1b   :  { %s874_s22 = scalar_lea.vmem %s25_s27, 64  ;;  %p879_p12 = scmp.lt.s32.totalorder %s25_s27, %s25_s27 }
  0x1c   :  { %p875_p11 = scmp.ne.s32.totalorder %s25_s27, %s874_s22  ;;  %p880_p13 = scmp.lt.s32.totalorder %s874_s22, %s874_s22 }
  0x1e   :  { %p881_p0 = por %p880_p13, %p879_p12 }
  0x20   :  { %p882_p1 = pnand %p881_p0, %p875_p11 }
  0x22   :  { %885 = shalt.err (!%p882_p1)
}
  0x23   :  { %27 = dma.hbm_to_vmem [thread:$0]  %s1163_s0, 64, %s25_s27, [#allocation5]  }
  0x24   :  { %s1008_s24 = smov [#allocation9]   ;;  %s1009_s26 = smov [#allocation10]  }
  0x25   :  { %s44_s25 = sshll.u32 %s1008_s24, 4  ;;  %s53_s28 = sshll.u32 %s1009_s26, 4  ;;  %s45_s25 = int_to_ptr.vmem [resolvable:$true] %s44_s25  ;;  %s1079_s28 = int_to_ptr.vmem [resolvable:$true] %s53_s28 }
  0x26   :  { %s886_s8 = scalar_lea.hbm %s1165_s2, 128 }
  0x27   :  { %p887_p2 = scmp.ne.s32.totalorder %s1165_s2, %s886_s8  ;;  %p890_p3 = scmp.lt.u32.totalorder %s886_s8, %s1165_s2 }
  0x29   :  { %p892_p4 = pnand %p890_p3, %p887_p2 }
  0x2b   :  { %895 = shalt.err (!%p892_p4)
}
  0x2c   :  { %s896_s0 = scalar_lea.vmem %s45_s25, 128  ;;  %p901_p6 = scmp.lt.s32.totalorder %s45_s25, %s45_s25 }
  0x2d   :  { %p897_p5 = scmp.ne.s32.totalorder %s45_s25, %s896_s0  ;;  %p902_p7 = scmp.lt.s32.totalorder %s896_s0, %s896_s0 }
  0x2f   :  { %p903_p8 = por %p902_p7, %p901_p6 }
  0x31   :  { %p904_p9 = pnand %p903_p8, %p897_p5 }
  0x33   :  { %907 = shalt.err (!%p904_p9)
}
  0x34   :  { %47 = dma.hbm_to_vmem [thread:$0]  %s1165_s2, 128, %s45_s25, [#allocation8]  }
  0x35   :  { %s908_s16 = scalar_lea.hbm %s1166_s3, 8192 }
  0x36   :  { %p909_p10 = scmp.ne.s32.totalorder %s1166_s3, %s908_s16  ;;  %p912_p11 = scmp.lt.u32.totalorder %s908_s16, %s1166_s3 }
  0x38   :  { %p914_p12 = pnand %p912_p11, %p909_p10 }
  0x3a   :  { %917 = shalt.err (!%p914_p12)
}
  0x3b   :  { %s918_s21 = scalar_lea.vmem %s1079_s28, 8192  ;;  %p923_p0 = scmp.lt.s32.totalorder %s1079_s28, %s1079_s28 }
  0x3c   :  { %p919_p13 = scmp.ne.s32.totalorder %s1079_s28, %s918_s21  ;;  %p924_p1 = scmp.lt.s32.totalorder %s918_s21, %s918_s21 }
  0x3e   :  { %p925_p2 = por %p924_p1, %p923_p0 }
  0x40   :  { %p926_p3 = pnand %p925_p2, %p919_p13 }
  0x42   :  { %929 = shalt.err (!%p926_p3)
}
  0x43   :  { %s1010_s2 = smov 256   ;;  %s1011_s22 = smov 16  }
  0x44   :  { %59 = dma.hbm_to_vmem [thread:$0]  %s1166_s3, 8192, %s1079_s28, [#allocation11], %s1010_s2, %s1010_s2, %s1011_s22  }
  0x45   :  { %996 = dma.done.wait [#allocation5], 64  }
  0x46   :  { %997 = vsyncadd [#allocation5], 4294967232 }
  0x47   :  { %998 = dma.done.wait [#allocation8], 256  }
  0x48   :  { %999 = vsyncadd [#allocation8], 4294967040 }
  0x49   :  { %1000 = dma.done.wait [#allocation11], 8192  }
  0x4a   :  { %1001 = vsyncadd [#allocation11], 4294959104  ;;  %v730_v0 = vld [vmem:[#allocation10 + $0x4] ss:$16 sps:$4 sm:$0xff]   ;;  %v732_v1 = vld [vmem:[#allocation10] ss:$16 sps:$4 sm:$0xff]  }
  0x4b   :  { %494 = vmatprep.subr.bf16.mxu0 %v730_v0  ;;  %v733_v2 = vld [vmem:[#allocation10 + $0x24] ss:$16 sps:$4 sm:$0xff]   ;;  %v735_v3 = vld [vmem:[#allocation10 + $0x20] ss:$16 sps:$4 sm:$0xff]   ;;  %v741_v5 = vld [vmem:[#allocation10 + $0xc] ss:$16 sps:$4 sm:$0xff]  }
  0x4c   :  { %495 = vmatpush1.bf16.msra.mxu0 %v732_v1  ;;  %v736_v4 = vld [vmem:[#allocation10 + $0x44] ss:$16 sps:$4 sm:$0xff]   ;;  %v744_v6 = vld [vmem:[#allocation10 + $0x8] ss:$16 sps:$4 sm:$0xff]   ;;  %v738_v7 = vld [vmem:[#allocation10 + $0x40] ss:$16 sps:$4 sm:$0xff]   ;;  %535 = vmatprep.subr.bf16.mxu1 %v741_v5 }
  0x4d   :  { %496 = vmatprep.subr.bf16.mxu0 %v733_v2  ;;  %v739_v8 = vld [vmem:[#allocation10 + $0x64] ss:$16 sps:$4 sm:$0xff]   ;;  %536 = vmatpush1.bf16.msra.mxu1 %v744_v6  ;;  %v747_v9 = vld [vmem:[#allocation10 + $0x2c] ss:$16 sps:$4 sm:$0xff]   ;;  %v750_v10 = vld [vmem:[#allocation10 + $0x28] ss:$16 sps:$4 sm:$0xff]   ;;  %v154_v6 = vlaneseq }
  0x4e   :  { %537 = vmatprep.subr.bf16.mxu1 %v747_v9  ;;  %v743_v11 = vld [vmem:[#allocation10 + $0x60] ss:$16 sps:$4 sm:$0xff]   ;;  %v745_v12 = vld [vmem:[#allocation10 + $0x84] ss:$16 sps:$4 sm:$0xff]   ;;  %v753_v13 = vld [vmem:[#allocation10 + $0x4c] ss:$16 sps:$4 sm:$0xff]  }
  0x4f   :  { %v756_v14 = vld [vmem:[#allocation10 + $0x48] ss:$16 sps:$4 sm:$0xff]   ;;  %v759_v15 = vld [vmem:[#allocation10 + $0x6c] ss:$16 sps:$4 sm:$0xff]   ;;  %v749_v16 = vld [vmem:[#allocation10 + $0x80] ss:$16 sps:$4 sm:$0xff]  }
  0x50   :  { %497 = vmatpush1.bf16.msra.mxu0 %v735_v3  ;;  %v751_v17 = vld [vmem:[#allocation10 + $0xa4] ss:$16 sps:$4 sm:$0xff]   ;;  %v762_v18 = vld [vmem:[#allocation10 + $0x68] ss:$16 sps:$4 sm:$0xff]   ;;  %v765_v19 = vld [vmem:[#allocation10 + $0x8c] ss:$16 sps:$4 sm:$0xff]  }
  0x51   :  { %498 = vmatprep.subr.bf16.mxu0 %v736_v4  ;;  %538 = vmatpush1.bf16.msra.mxu1 %v750_v10  ;;  %v755_v20 = vld [vmem:[#allocation10 + $0xa0] ss:$16 sps:$4 sm:$0xff]   ;;  %v757_v21 = vld [vmem:[#allocation10 + $0xc4] ss:$16 sps:$4 sm:$0xff]   ;;  %v768_v22 = vld [vmem:[#allocation10 + $0x88] ss:$16 sps:$4 sm:$0xff]  }
  0x52   :  { %539 = vmatprep.subr.bf16.mxu1 %v753_v13  ;;  %v771_v23 = vld [vmem:[#allocation10 + $0xac] ss:$16 sps:$4 sm:$0xff]   ;;  %v761_v24 = vld [vmem:[#allocation10 + $0xc0] ss:$16 sps:$4 sm:$0xff]   ;;  %v763_v25 = vld [vmem:[#allocation10 + $0xe4] ss:$16 sps:$4 sm:$0xff]  }
  0x53   :  { %v774_v26 = vld [vmem:[#allocation10 + $0xa8] ss:$16 sps:$4 sm:$0xff]   ;;  %v777_v27 = vld [vmem:[#allocation10 + $0xcc] ss:$16 sps:$4 sm:$0xff]   ;;  %v767_v28 = vld [vmem:[#allocation10 + $0xe0] ss:$16 sps:$4 sm:$0xff]  }
  0x54   :  { %499 = vmatpush1.bf16.msra.mxu0 %v738_v7  ;;  %v769_v29 = vld [vmem:[#allocation10 + $0x104] ss:$16 sps:$4 sm:$0xff]   ;;  %v780_v30 = vld [vmem:[#allocation10 + $0xc8] ss:$16 sps:$4 sm:$0xff]   ;;  %v783_v31 = vld [vmem:[#allocation10 + $0xec] ss:$16 sps:$4 sm:$0xff]  }
  0x55   :  { %500 = vmatprep.subr.bf16.mxu0 %v739_v8  ;;  %540 = vmatpush1.bf16.msra.mxu1 %v756_v14  ;;  %v773_v32 = vld [vmem:[#allocation10 + $0x100] ss:$16 sps:$4 sm:$0xff]   ;;  %v775_v33 = vld [vmem:[#allocation10 + $0x124] ss:$16 sps:$4 sm:$0xff]   ;;  %v786_v34 = vld [vmem:[#allocation10 + $0xe8] ss:$16 sps:$4 sm:$0xff]  }
  0x56   :  { %541 = vmatprep.subr.bf16.mxu1 %v759_v15  ;;  %v789_v35 = vld [vmem:[#allocation10 + $0x10c] ss:$16 sps:$4 sm:$0xff]   ;;  %v779_v36 = vld [vmem:[#allocation10 + $0x120] ss:$16 sps:$4 sm:$0xff]   ;;  %v781_v37 = vld [vmem:[#allocation10 + $0x144] ss:$16 sps:$4 sm:$0xff]  }
  0x57   :  { %v792_v38 = vld [vmem:[#allocation10 + $0x108] ss:$16 sps:$4 sm:$0xff]   ;;  %v795_v39 = vld [vmem:[#allocation10 + $0x12c] ss:$16 sps:$4 sm:$0xff]   ;;  %v78_v40 = vld [vmem:[#allocation7] sm:$0xff]  ;;  %v155_v7 = vshrl.u32 %v154_v6, 7 }
  0x58   :  { %501 = vmatpush1.bf16.msra.mxu0 %v743_v11  ;;  %v785_v41 = vld [vmem:[#allocation10 + $0x140] ss:$16 sps:$4 sm:$0xff]   ;;  %v87_v42 = vpack.c.bf16 %v78_v40, %v78_v40  ;;  %v787_v43 = vld [vmem:[#allocation10 + $0x164] ss:$16 sps:$4 sm:$0xff]   ;;  %v798_v44 = vld [vmem:[#allocation10 + $0x128] ss:$16 sps:$4 sm:$0xff]  }
  0x59   :  { %502 = vmatprep.subr.bf16.mxu0 %v745_v12  ;;  %542 = vmatpush1.bf16.msra.mxu1 %v762_v18  ;;  %v801_v45 = vld [vmem:[#allocation10 + $0x14c] ss:$16 sps:$4 sm:$0xff]   ;;  %v791_v46 = vld [vmem:[#allocation10 + $0x160] ss:$16 sps:$4 sm:$0xff]   ;;  %v793_v47 = vld [vmem:[#allocation10 + $0x184] ss:$16 sps:$4 sm:$0xff]  }
  0x5a   :  { %543 = vmatprep.subr.bf16.mxu1 %v765_v19  ;;  %526 = vmatprep.mubr.bf16.mxu0 %v87_v42  ;;  %v804_v48 = vld [vmem:[#allocation10 + $0x148] ss:$16 sps:$4 sm:$0xff]   ;;  %v807_v49 = vld [vmem:[#allocation10 + $0x16c] ss:$16 sps:$4 sm:$0xff]   ;;  %v797_v50 = vld [vmem:[#allocation10 + $0x180] ss:$16 sps:$4 sm:$0xff]  }
  0x5b   :  { %567 = vmatprep.mubr.bf16.mxu1 %v87_v42  ;;  %v799_v51 = vld [vmem:[#allocation10 + $0x1a4] ss:$16 sps:$4 sm:$0xff]   ;;  %v810_v52 = vld [vmem:[#allocation10 + $0x168] ss:$16 sps:$4 sm:$0xff]   ;;  %v813_v53 = vld [vmem:[#allocation10 + $0x18c] ss:$16 sps:$4 sm:$0xff]  }
  0x5c   :  { %503 = vmatpush1.bf16.msra.mxu0 %v749_v16  ;;  %v803_v54 = vld [vmem:[#allocation10 + $0x1a0] ss:$16 sps:$4 sm:$0xff]   ;;  %v82_v55 = vld [vmem:[#allocation4] sm:$0xf]  ;;  %v805_v56 = vld [vmem:[#allocation10 + $0x1c4] ss:$16 sps:$4 sm:$0xff]  }
  0x5d   :  { %504 = vmatprep.subr.bf16.mxu0 %v751_v17  ;;  %544 = vmatpush1.bf16.msra.mxu1 %v768_v22  ;;  %v816_v57 = vld [vmem:[#allocation10 + $0x188] ss:$16 sps:$4 sm:$0xff]   ;;  %v817_v58 = vld [vmem:[#allocation10 + $0x1ac] ss:$16 sps:$4 sm:$0xff]   ;;  %v83_v59 = vunpack.c.l.bf16 %v82_v55  ;;  %v809_v60 = vld [vmem:[#allocation10 + $0x1c0] ss:$16 sps:$4 sm:$0xff]  }
  0x5e   :  { %545 = vmatprep.subr.bf16.mxu1 %v771_v23  ;;  %v811_v61 = vld [vmem:[#allocation10 + $0x1e4] ss:$16 sps:$4 sm:$0xff]   ;;  %v819_v62 = vld [vmem:[#allocation10 + $0x1a8] ss:$16 sps:$4 sm:$0xff]   ;;  %v820_v63 = vld [vmem:[#allocation10 + $0x1cc] ss:$16 sps:$4 sm:$0xff]  }
  0x5f   :  { %v84_v0 = vmax.f32 %v83_v59, 0.0  ;;  %v815_v1 = vld [vmem:[#allocation10 + $0x1e0] ss:$16 sps:$4 sm:$0xff]   ;;  %v822_v2 = vld [vmem:[#allocation10 + $0x1c8] ss:$16 sps:$4 sm:$0xff]   ;;  %v156_v8 = vsub.s32 0, %v155_v7 }
  0x60   :  { %505 = vmatpush1.bf16.msra.mxu0 %v755_v20  ;;  %v823_v3 = vld [vmem:[#allocation10 + $0x1ec] ss:$16 sps:$4 sm:$0xff]   ;;  %v825_v5 = vld [vmem:[#allocation10 + $0x1e8] ss:$16 sps:$4 sm:$0xff]   ;;  %v160_v10 = vsub.s32 1, %v155_v7  ;;  %v168_v13 = vsub.s32 3, %v155_v7 }
  0x61   :  { %506 = vmatprep.subr.bf16.mxu0 %v757_v21  ;;  %546 = vmatpush1.bf16.msra.mxu1 %v774_v26  ;;  %v86_v4 = vpack.c.bf16 %v84_v0, %v84_v0  ;;  %v152_v9 = vld [vmem:[%s1167_s4] sm:$0xf]  ;;  %v164_v23 = vsub.s32 2, %v155_v7  ;;  %s1012_s4 = smov [#allocation13]   ;;  %s1013_s26 = smov [#allocation15]  }
  0x62   :  { %547 = vmatprep.subr.bf16.mxu1 %v777_v27  ;;  %v157_v11 = vrot.slane %v152_v9, %v156_v8  ;;  %v161_v12 = vrot.slane %v152_v9, %v160_v10  ;;  %v169_v21 = vrot.slane %v152_v9, %v168_v13  ;;  %s626_s25 = sshll.u32 %s1012_s4, 4  ;;  %s636_s28 = sshll.u32 %s1013_s26, 4  ;;  %s627_s25 = int_to_ptr.vmem [resolvable:$true] %s626_s25  ;;  %s1113_s28 = int_to_ptr.vmem [resolvable:$true] %s636_s28 }
  0x63   :  { %s1014_s29 = smov [#allocation12]   ;;  %s930_s8 = scalar_lea.vmem %s627_s25, 128 }
  0x64   :  { %507 = vmatpush1.bf16.msra.mxu0 %v761_v24  ;;  %s616_s30 = sshll.u32 %s1014_s29, 4  ;;  %p931_p4 = scmp.ne.s32.totalorder %s627_s25, %s930_s8  ;;  %s1115_s30 = int_to_ptr.vmem [resolvable:$true] %s616_s30 }
  0x65   :  { %508 = vmatprep.subr.bf16.mxu0 %v763_v25  ;;  %548 = vmatpush1.bf16.msra.mxu1 %v780_v30  ;;  %p935_p5 = scmp.lt.s32.totalorder %s627_s25, %s627_s25  ;;  %p936_p6 = scmp.lt.s32.totalorder %s930_s8, %s930_s8 }
  0x66   :  { %549 = vmatprep.subr.bf16.mxu1 %v783_v31 }
  0x67   :  { %p937_p7 = por %p936_p6, %p935_p5 }
  0x68   :  { %509 = vmatpush1.bf16.msra.mxu0 %v767_v28  ;;  %v165_v28 = vrot.slane %v152_v9, %v164_v23 }
  0x69   :  { %510 = vmatprep.subr.bf16.mxu0 %v769_v29  ;;  %550 = vmatpush1.bf16.msra.mxu1 %v786_v34  ;;  %p938_p8 = pnand %p937_p7, %p931_p4 }
  0x6a   :  { %551 = vmatprep.subr.bf16.mxu1 %v789_v35 }
  0x6c   :  { %511 = vmatpush1.bf16.msra.mxu0 %v773_v32 }
  0x6d   :  { %512 = vmatprep.subr.bf16.mxu0 %v775_v33  ;;  %552 = vmatpush1.bf16.msra.mxu1 %v792_v38  ;;  %v80_v38 = vld [vmem:[#allocation9] sm:$0xff] }
  0x6e   :  { %553 = vmatprep.subr.bf16.mxu1 %v795_v39 }
  0x70   :  { %513 = vmatpush1.bf16.msra.mxu0 %v779_v36 }
  0x71   :  { %514 = vmatprep.subr.bf16.mxu0 %v781_v37  ;;  %554 = vmatpush1.bf16.msra.mxu1 %v798_v44 }
  0x72   :  { %555 = vmatprep.subr.bf16.mxu1 %v801_v45 }
  0x74   :  { %515 = vmatpush1.bf16.msra.mxu0 %v785_v41 }
  0x75   :  { %516 = vmatprep.subr.bf16.mxu0 %v787_v43  ;;  %556 = vmatpush1.bf16.msra.mxu1 %v804_v48 }
  0x76   :  { %557 = vmatprep.subr.bf16.mxu1 %v807_v49 }
  0x78   :  { %517 = vmatpush1.bf16.msra.mxu0 %v791_v46 }
  0x79   :  { %518 = vmatprep.subr.bf16.mxu0 %v793_v47  ;;  %558 = vmatpush1.bf16.msra.mxu1 %v810_v52 }
  0x7a   :  { %559 = vmatprep.subr.bf16.mxu1 %v813_v53 }
  0x7c   :  { %519 = vmatpush1.bf16.msra.mxu0 %v797_v50 }
  0x7d   :  { %520 = vmatprep.subr.bf16.mxu0 %v799_v51  ;;  %560 = vmatpush1.bf16.msra.mxu1 %v816_v57 }
  0x7e   :  { %561 = vmatprep.subr.bf16.mxu1 %v817_v58 }
  0x80   :  { %521 = vmatpush1.bf16.msra.mxu0 %v803_v54 }
  0x81   :  { %522 = vmatprep.subr.bf16.mxu0 %v805_v56  ;;  %562 = vmatpush1.bf16.msra.mxu1 %v819_v62 }
  0x82   :  { %563 = vmatprep.subr.bf16.mxu1 %v820_v63 }
  0x84   :  { %523 = vmatpush1.bf16.msra.mxu0 %v809_v60 }
  0x85   :  { %524 = vmatprep.subr.bf16.mxu0 %v811_v61  ;;  %564 = vmatpush1.bf16.msra.mxu1 %v822_v2 }
  0x86   :  { %565 = vmatprep.subr.bf16.mxu1 %v823_v3 }
  0x88   :  { %525 = vmatpush1.bf16.msra.mxu0 %v815_v1 }
  0x89   :  { %566 = vmatpush1.bf16.msra.mxu1 %v825_v5 }
  0x8b   :  { %527 = vmatmul.mubr.bf16.vlgmr.msra.gmra.mrb[0].mxu0 %v86_v4 }
  0x8c   :  { %568 = vmatmul.mubr.bf16.vlgmr.msra.gmra.mrb[0].mxu1 %v86_v4 }
 0x15e   :  { %v528_v14 = vpop.f32.mrb[0].mxu0 }
 0x15f   :  { %v529_v15 = vadd.f32 %v528_v14, %v157_v11  ;;  %v530_v16 = vpop.f32.mrb[1].mxu0  ;;  %v569_v24 = vpop.f32.mrb[0].mxu1 }
 0x160   :  { %v531_v17 = vadd.f32 %v530_v16, %v161_v12  ;;  %v532_v18 = vpop.f32.mrb[2].mxu0  ;;  %v571_v25 = vpop.f32.mrb[1].mxu1  ;;  %v570_v31 = vadd.f32 %v569_v24, %v165_v28 }
 0x161   :  { %v718_v19 = vmul.f32 -1.442695, %v529_v15  ;;  %v533_v20 = vpop.f32.mrb[3].mxu0  ;;  %v572_v26 = vadd.f32 %v571_v25, %v169_v21  ;;  %v573_v27 = vpop.f32.mrb[2].mxu1 }
 0x162   :  { %v719_v22 = vmul.f32 -1.442695, %v531_v17  ;;  %v574_v29 = vpop.f32.mrb[3].mxu1 }
 0x163   :  { %826 = vpow2.f32 %v718_v19  ;;  %v720_v30 = vmul.f32 -1.442695, %v572_v26 }
 0x164   :  { %828 = vpow2.f32 %v719_v22 }
 0x165   :  { %830 = vpow2.f32 %v720_v30 }
 0x166   :  { %832 = vtanh.f32 %v570_v31 }
 0x16d   :  { %v827_v32 = vpop.eup %826 }
 0x16e   :  { %v829_v33 = vpop.eup %828  ;;  %v579_v34 = vadd.f32 1.0, %v827_v32 }
 0x16f   :  { %v585_v35 = vadd.f32 1.0, %v829_v33  ;;  %v831_v36 = vpop.eup %830 }
 0x170   :  { %834 = vrcp.f32 %v579_v34  ;;  %v833_v37 = vpop.eup %832  ;;  %v592_v40 = vadd.f32 1.0, %v831_v36 }
 0x171   :  { %836 = vrcp.f32 %v585_v35 }
 0x172   :  { %838 = vrcp.f32 %v592_v40 }
 0x17a   :  { %v835_v39 = vpop.eup %834 }
 0x17b   :  { %v837_v41 = vpop.eup %836  ;;  %v597_v42 = vmul.f32 %v835_v39, %v833_v37 }
 0x17c   :  { %v596_v43 = vmul.f32 %v837_v41, %v80_v38  ;;  %v839_v45 = vpop.eup %838 }
 0x17e   :  { %v598_v44 = vadd.f32 %v597_v42, %v596_v43 }
 0x180   :  { %609 = vst [vmem:[#allocation15] sm:$0xff] %v598_v44  ;;  %840 = vtanh.f32 %v598_v44 }
 0x18a   :  { %v841_v46 = vpop.eup %840 }
 0x18b   :  { %v600_v47 = vmul.f32 %v841_v46, %v839_v45 }
 0x18d   :  { %608 = vst [vmem:[#allocation13] sm:$0xff] %v600_v47  ;;  %v603_v48 = vpack.c.bf16 %v600_v47, %v600_v47 }
 0x18e   :  { %941 = shalt.err (!%p938_p8)
}
 0x18f   :  { %s942_s11 = scalar_lea.hbm %s1169_s6, 128 }
 0x190   :  { %p943_p9 = scmp.ne.s32.totalorder %s1169_s6, %s942_s11  ;;  %p946_p10 = scmp.lt.u32.totalorder %s942_s11, %s1169_s6 }
 0x192   :  { %p948_p11 = pnand %p946_p10, %p943_p9 }
 0x194   :  { %951 = shalt.err (!%p948_p11)
}
 0x195   :  { %629 = dma.vmem_to_hbm [thread:$0]  %s627_s25, 128, %s1169_s6, [#allocation14]   ;;  %604 = vst [vmem:[#allocation12] sm:$0xf] %v603_v48 }
 0x196   :  { %s952_s16 = scalar_lea.vmem %s1113_s28, 128  ;;  %p957_p13 = scmp.lt.s32.totalorder %s1113_s28, %s1113_s28 }
 0x197   :  { %p953_p12 = scmp.ne.s32.totalorder %s1113_s28, %s952_s16  ;;  %p958_p0 = scmp.lt.s32.totalorder %s952_s16, %s952_s16 }
 0x199   :  { %p959_p1 = por %p958_p0, %p957_p13 }
 0x19b   :  { %p960_p2 = pnand %p959_p1, %p953_p12 }
 0x19d   :  { %963 = shalt.err (!%p960_p2)
}
 0x19e   :  { %s964_s19 = scalar_lea.hbm %s1170_s7, 128 }
 0x19f   :  { %p965_p3 = scmp.ne.s32.totalorder %s1170_s7, %s964_s19  ;;  %p968_p4 = scmp.lt.u32.totalorder %s964_s19, %s1170_s7 }
 0x1a1   :  { %p970_p5 = pnand %p968_p4, %p965_p3 }
 0x1a3   :  { %973 = shalt.err (!%p970_p5)
}
 0x1a4   :  { %639 = dma.vmem_to_hbm [thread:$0]  %s1113_s28, 128, %s1170_s7, [#allocation14]  }
 0x1a5   :  { %s974_s23 = scalar_lea.vmem %s1115_s30, 64  ;;  %p979_p7 = scmp.lt.s32.totalorder %s1115_s30, %s1115_s30 }
 0x1a6   :  { %p975_p6 = scmp.ne.s32.totalorder %s1115_s30, %s974_s23  ;;  %p980_p8 = scmp.lt.s32.totalorder %s974_s23, %s974_s23 }
 0x1a8   :  { %p981_p9 = por %p980_p8, %p979_p7 }
 0x1aa   :  { %p982_p10 = pnand %p981_p9, %p975_p6 }
 0x1ac   :  { %985 = shalt.err (!%p982_p10)
}
 0x1ad   :  { %s986_s4 = scalar_lea.hbm %s1168_s5, 64 }
 0x1ae   :  { %p987_p11 = scmp.ne.s32.totalorder %s1168_s5, %s986_s4  ;;  %p990_p12 = scmp.lt.u32.totalorder %s986_s4, %s1168_s5 }
 0x1b0   :  { %p992_p13 = pnand %p990_p12, %p987_p11 }
 0x1b2   :  { %995 = shalt.err (!%p992_p13)
}
 0x1b3   :  { %619 = dma.vmem_to_hbm [thread:$0]  %s1115_s30, 64, %s1168_s5, [#allocation6]  }
 0x1b4   :  { %1002 = dma.done.wait [#allocation6], 64  }
 0x1b5   :  { %1003 = vsyncadd [#allocation6], 4294967232 }
 0x1b6   :  { %1004 = dma.done.wait [#allocation14], 256  }
 0x1b7   :  { %1005 = vsyncadd [#allocation14], 4294967040 }
 0x1b8   :  { %649 = vsyncpa [#allocation5], 1 }
 0x1b9   :  { %650 = vsyncpa [#allocation8], 1 }
 0x1ba   :  { %651 = vsyncpa [#allocation11], 1 }
 0x1bb   :  { %652 = vsyncpa [#allocation6], 1 }
 0x1bc   :  { %653 = vsyncpa [#allocation14], 1 }

</bundles_post_ra>
